<compile_context>
chip_gen: v7x
topology: tpu7x:2x2x1
jax: 0.10.0
libtpu: 0.0.40
codegen_flags: <defaults>
</compile_context>

<pallas_src>
import math
from functools import partial

import jax
import jax.numpy as jnp
from jax.experimental import pallas as pl
from jax.experimental.pallas import tpu as pltpu


def _round_up(x: int, m: int) -> int:
    return ((x + m - 1) // m) * m


def _choose_tn(dim_out: int, tn: int) -> int:
    """Pick an N tile: use `tn` if it evenly divides dim_out, else the full dim."""
    if tn >= dim_out or dim_out % tn != 0:
        return dim_out
    return tn


def _geglu_kernel(x_ref, w_ref, b_ref, o_ref, *, tn: int):
    # x_ref: (tm, dim_in)        row tile of flattened hidden_states
    # w_ref: (dim_in, 2*tn)      paired weight tile: [hidden cols | gate cols]
    # b_ref: (1, 2*tn)           paired bias tile (f32)
    # o_ref: (tm, tn)            output tile
    x = x_ref[...]
    # Single fused matmul for hidden+gate of this N tile; f32 accumulation.
    y = jnp.dot(x, w_ref[...], preferred_element_type=jnp.float32) + b_ref[...]
    hidden = y[:, :tn]
    gate = y[:, tn:]
    # Exact GELU: 0.5 * g * (1 + erf(g / sqrt(2)))  — matches F.gelu default.
    gelu_gate = 0.5 * gate * (1.0 + jax.lax.erf(gate * (1.0 / math.sqrt(2.0))))
    o_ref[...] = (hidden * gelu_gate).astype(o_ref.dtype)


def prepare_geglu_params(weight, bias, *, tn: int = 512, compute_dtype=None):
    """One-time (model-init) parameter preparation.

    weight: (2*dim_out, dim_in)  PyTorch nn.Linear layout
    bias:   (2*dim_out,)

    Returns (w_paired, b_paired, dim_out, tn_eff) where w_paired has shape
    (dim_in, 2*dim_out) with columns re-ordered so that column block j of
    width 2*tn_eff holds [hidden columns j*tn:(j+1)*tn | gate columns ...].
    Doing the transpose/pairing here (once) avoids a full HBM transpose of
    the weight on every forward call.
    """
    two_dim_out, dim_in = weight.shape
    dim_out = two_dim_out // 2
    tn_eff = _choose_tn(dim_out, tn)
    n_n = dim_out // tn_eff

    w_t = weight.T  # (dim_in, 2*dim_out) — done ONCE at init, not per call.
    w_h = w_t[:, :dim_out].reshape(dim_in, n_n, tn_eff)
    w_g = w_t[:, dim_out:].reshape(dim_in, n_n, tn_eff)
    w_paired = jnp.concatenate([w_h, w_g], axis=2).reshape(dim_in, 2 * dim_out)

    b_h = bias[:dim_out].reshape(n_n, tn_eff)
    b_g = bias[dim_out:].reshape(n_n, tn_eff)
    b_paired = (
        jnp.concatenate([b_h, b_g], axis=1)
        .reshape(1, 2 * dim_out)
        .astype(jnp.float32)  # bias added after f32 accumulation
    )

    if compute_dtype is not None:
        w_paired = w_paired.astype(compute_dtype)
    return w_paired, b_paired, dim_out, tn_eff


def geglu_pallas_prepared(
    x,
    w_paired,
    b_paired,
    dim_out: int,
    tn: int,
    *,
    tm: int = 256,          # v6e/v7x: 256; v5e: 128 is plenty (128x128 MXU)
    compute_dtype=None,     # e.g. jnp.bfloat16 on v6e/v7x for ~2x MXU rate
    scale: float = 1.0,     # LoRA scale; no-op (no LoRA adapters attached)
):
    """GEGLU forward with pre-prepared (paired) weights."""
    del scale  # plain nn.Linear semantics — identical to PyTorch without LoRA

    *lead, dim_in = x.shape
    M = 1
    for d in lead:
        M *= d
    out_dtype = x.dtype

    x2d = x.reshape(M, dim_in)
    if compute_dtype is not None:
        x2d = x2d.astype(compute_dtype)

    # Row tile: big, multiple of 8 sublanes; pad M up instead of shrinking tm.
    tm_eff = max(8, min(tm, _round_up(M, 8)))
    M_pad = _round_up(M, tm_eff)
    if M_pad != M:
        x2d = jnp.pad(x2d, ((0, M_pad - M), (0, 0)))

    n_m = M_pad // tm_eff
    n_n = dim_out // tn

    # Explicit VMEM budget: double-buffered tiles + f32 intermediate + headroom.
    per_step = (
        tm_eff * dim_in * x2d.dtype.itemsize          # x tile
        + dim_in * 2 * tn * w_paired.dtype.itemsize   # paired weight tile
        + 2 * tn * 4                                  # bias tile (f32)
        + tm_eff * tn * jnp.dtype(out_dtype).itemsize # out tile
    )
    f32_inter = tm_eff * 2 * tn * 4                   # y = x @ w (f32)
    vmem_limit = int(min(max(2 * per_step + f32_inter + (8 << 20), 32 << 20),
                         100 << 20))
    # NOTE: on v7x (64 MiB physical VMEM) keep tm/tn such that the above sum
    # stays well under ~56 MiB; the defaults here do.

    out2d = pl.pallas_call(
        partial(_geglu_kernel, tn=tn),
        out_shape=jax.ShapeDtypeStruct((M_pad, dim_out), out_dtype),
        grid_spec=pltpu.PrefetchScalarGridSpec(
            num_scalar_prefetch=0,
            # N outer, M inner: the weight tile index is constant along the
            # inner axis -> stays resident in VMEM, weight HBM traffic = 1x.
            grid=(n_n, n_m),
            in_specs=[
                pl.BlockSpec((tm_eff, dim_in), lambda j, i: (i, 0)),
                pl.BlockSpec((dim_in, 2 * tn), lambda j, i: (0, j)),
                pl.BlockSpec((1, 2 * tn), lambda j, i: (0, j)),
            ],
            out_specs=pl.BlockSpec((tm_eff, tn), lambda j, i: (i, j)),
        ),
        compiler_params=pltpu.CompilerParams(
            dimension_semantics=("parallel", "parallel"),  # megacore-friendly
            vmem_limit_bytes=vmem_limit,
        ),
    )(x2d, w_paired, b_paired)

    out2d = out2d[:M]
    return out2d.reshape(*lead, dim_out)


def geglu_pallas(x, weight, bias, *, scale: float = 1.0, tm: int = 256,
                 tn: int = 512, compute_dtype=None):
    """Convenience wrapper: prepares weights then calls the kernel.

    For production use, call prepare_geglu_params() ONCE at model init and
    geglu_pallas_prepared() per forward step to avoid the per-call transpose.
    """
    w_paired, b_paired, dim_out, tn_eff = prepare_geglu_params(
        weight, bias, tn=tn, compute_dtype=compute_dtype
    )
    return geglu_pallas_prepared(
        x, w_paired, b_paired, dim_out, tn_eff,
        tm=tm, compute_dtype=compute_dtype, scale=scale,
    )


def _geglu_reference(x, weight, bias):
    y = jnp.einsum("...i,oi->...o", x, weight) + bias
    hidden, gate = jnp.split(y, 2, axis=-1)
    return hidden * (0.5 * gate * (1.0 + jax.lax.erf(gate / math.sqrt(2.0))))


if __name__ == "__main__":
    batch, seq, dim_in, dim_out = 2, 8, 256, 128

    key = jax.random.PRNGKey(0)
    kx, kw, kb = jax.random.split(key, 3)

    x = jax.random.normal(kx, (batch, seq, dim_in), dtype=jnp.float32)
    # Deterministic init mimicking nn.Linear's uniform(-1/sqrt(fan_in), 1/sqrt(fan_in))
    bound = 1.0 / math.sqrt(dim_in)
    weight = jax.random.uniform(
        kw, (2 * dim_out, dim_in), minval=-bound, maxval=bound, dtype=jnp.float32
    )
    bias = jax.random.uniform(
        kb, (2 * dim_out,), minval=-bound, maxval=bound, dtype=jnp.float32
    )

    ref = _geglu_reference(x, weight, bias)

    # f32 path (exercises the convenience wrapper).
    out = geglu_pallas(x, weight, bias, scale=1.0)
    out = jax.block_until_ready(out)
    assert out.shape == (batch, seq, dim_out)
    assert jnp.allclose(out, ref, atol=1e-5, rtol=1e-5)

    # bf16-matmul path (recommended on v6e/v7x), prep-once + per-step call.
    w_p, b_p, d_out, tn_eff = prepare_geglu_params(
        weight, bias, tn=512, compute_dtype=jnp.bfloat16
    )
    out_bf16 = geglu_pallas_prepared(
        x, w_p, b_p, d_out, tn_eff, tm=256, compute_dtype=jnp.bfloat16
    )
    out_bf16 = jax.block_until_ready(out_bf16)
    assert out_bf16.shape == (batch, seq, dim_out)
    assert jnp.allclose(out_bf16, ref, atol=1e-1, rtol=1e-1)

    print("KERNEL_OK")
</pallas_src>

<mosaic_0001>
module attributes {stable_mosaic.version = 11 : i64} {
  func.func @_geglu_kernel(%arg0: i32, %arg1: i32, %arg2: memref<16x256xf32, #tpu.memory_space<vmem>>, %arg3: memref<256x256xf32, #tpu.memory_space<vmem>>, %arg4: memref<1x256xf32, #tpu.memory_space<vmem>>, %arg5: memref<16x128xf32, #tpu.memory_space<vmem>>) attributes {dimension_semantics = [#tpu.dimension_semantics<parallel>, #tpu.dimension_semantics<parallel>], iteration_bounds = array<i64: 1, 1>, scalar_prefetch = 0 : i64, scratch_operands = 0 : i64, tpu.core_type = #tpu.core_type<tc>, window_params = [{transform_indices = @transform_0, window_bounds = array<i64: 16, 256>}, {transform_indices = @transform_1, window_bounds = array<i64: 256, 256>}, {transform_indices = @transform_2, window_bounds = array<i64: 1, 256>}, {transform_indices = @transform_3, window_bounds = array<i64: 16, 128>}]} {
    %c0 = arith.constant 0 : index
    %c0_0 = arith.constant 0 : index
    %0 = vector.load %arg2[%c0, %c0_0] : memref<16x256xf32, #tpu.memory_space<vmem>>, vector<16x256xf32>
    %c0_1 = arith.constant 0 : index
    %c0_2 = arith.constant 0 : index
    %1 = vector.load %arg3[%c0_1, %c0_2] : memref<256x256xf32, #tpu.memory_space<vmem>>, vector<256x256xf32>
    %cst = arith.constant dense<0.000000e+00> : vector<16x256xf32>
    %2 = tpu.matmul %0, %1, %cst {dimension_numbers = #tpu.dot_dimension_numbers<[1], [0], [0], [1], [0, 0, 1, 1], [], []>} : vector<16x256xf32>, vector<256x256xf32>, vector<16x256xf32> -> vector<16x256xf32>
    %c0_3 = arith.constant 0 : index
    %c0_4 = arith.constant 0 : index
    %3 = vector.load %arg4[%c0_3, %c0_4] : memref<1x256xf32, #tpu.memory_space<vmem>>, vector<1x256xf32>
    %4 = vector.broadcast %3 : vector<1x256xf32> to vector<16x256xf32>
    %5 = arith.addf %2, %4 : vector<16x256xf32>
    %6 = vector.extract_strided_slice %5 {offsets = [0, 0], sizes = [16, 128], strides = [1, 1]} : vector<16x256xf32> to vector<16x128xf32>
    %7 = vector.extract_strided_slice %5 {offsets = [0, 128], sizes = [16, 128], strides = [1, 1]} : vector<16x256xf32> to vector<16x128xf32>
    %cst_5 = arith.constant 5.000000e-01 : f32
    %8 = vector.broadcast %cst_5 : f32 to vector<16x128xf32>
    %9 = arith.mulf %8, %7 : vector<16x128xf32>
    %cst_6 = arith.constant 0.707106769 : f32
    %10 = vector.broadcast %cst_6 : f32 to vector<16x128xf32>
    %11 = arith.mulf %7, %10 : vector<16x128xf32>
    %12 = math.erf %11 : vector<16x128xf32>
    %cst_7 = arith.constant 1.000000e+00 : f32
    %13 = vector.broadcast %cst_7 : f32 to vector<16x128xf32>
    %14 = arith.addf %13, %12 : vector<16x128xf32>
    %15 = arith.mulf %9, %14 : vector<16x128xf32>
    %16 = arith.mulf %6, %15 : vector<16x128xf32>
    %c0_8 = arith.constant 0 : index
    %c0_9 = arith.constant 0 : index
    %17 = vector.load %arg5[%c0_8, %c0_9] : memref<16x128xf32, #tpu.memory_space<vmem>>, vector<16x128xf32>
    tpu.vector_store %arg5[%c0_8, %c0_9], %16 {strides = array<i32>} : memref<16x128xf32, #tpu.memory_space<vmem>>, vector<16x128xf32>,
    return
  }
  func.func @transform_0(%arg0: i32, %arg1: i32) -> (i32, i32) {
    %c0_i32 = arith.constant 0 : i32
    %c0_i32_0 = arith.constant 0 : i32
    return %arg1, %c0_i32 : i32, i32
  }
  func.func @transform_1(%arg0: i32, %arg1: i32) -> (i32, i32) {
    %c0_i32 = arith.constant 0 : i32
    %c0_i32_0 = arith.constant 0 : i32
    return %c0_i32, %arg0 : i32, i32
  }
  func.func @transform_2(%arg0: i32, %arg1: i32) -> (i32, i32) {
    %c0_i32 = arith.constant 0 : i32
    %c0_i32_0 = arith.constant 0 : i32
    return %c0_i32, %arg0 : i32, i32
  }
  func.func @transform_3(%arg0: i32, %arg1: i32) -> (i32, i32) {
    %c0_i32 = arith.constant 0 : i32
    return %arg1, %arg0 : i32, i32
  }
}

</mosaic_0001>

<bundles_post_ra>
// kernel: tpu_custom_call.1
= control target key start
LH: loop header
LB: loop body
LE: loop exit
PB: predicated region body
PF: predicated region fallthrough
CT: control target
= control target key end

     0   :  { %8 = vsyncpa [#allocation3], 0  ;;  %s477_s0 = inlined_call_operand.hbm [shape: f32[16,256], index: 0, kind: input, shape index: {}]   ;;  %s478_s1 = inlined_call_operand.hbm [shape: f32[256,256], index: 1, kind: input, shape index: {}]   ;;  %s479_s2 = inlined_call_operand.vmem [shape: f32[1,256], index: 2, kind: input, shape index: {}]   ;;  %s480_s3 = inlined_call_operand.hbm [shape: f32[16,128], index: 3, kind: output, shape index: {}]  }
   0x1   :  { %9 = vsyncpa [#allocation6], 0 }
   0x2   :  { %10 = vsyncpa [#allocation4], 0  ;;  %s411_s12 = smov [#allocation2]   ;;  %s339_s16 = scalar_lea.hbm %s477_s0, 512 }
   0x3   :  { %s16_s13 = sshll.u32 %s411_s12, 4  ;;  %p340_p0 = scmp.ne.s32.totalorder %s477_s0, %s339_s16  ;;  %s17_s13 = int_to_ptr.vmem [resolvable:$true] %s16_s13 }
   0x4   :  { %p343_p1 = scmp.lt.u32.totalorder %s339_s16, %s477_s0 }
   0x6   :  { %p345_p2 = pnand %p343_p1, %p340_p0 }
   0x8   :  { %348 = shalt.err (!%p345_p2)
}
   0x9   :  { %s349_s21 = scalar_lea.vmem %s17_s13, 512  ;;  %p354_p4 = scmp.lt.s32.totalorder %s17_s13, %s17_s13 }
   0xa   :  { %p350_p3 = scmp.ne.s32.totalorder %s17_s13, %s349_s21  ;;  %p355_p5 = scmp.lt.s32.totalorder %s349_s21, %s349_s21 }
   0xc   :  { %p356_p6 = por %p355_p5, %p354_p4 }
   0xe   :  { %p357_p7 = pnand %p356_p6, %p350_p3 }
  0x10   :  { %360 = shalt.err (!%p357_p7)
}
  0x11   :  { %s412_s22 = smov 256   ;;  %s413_s23 = smov 16  }
  0x12   :  { %22 = dma.hbm_to_vmem [thread:$0]  %s477_s0, 512, %s17_s13, [#allocation3], %s412_s22, %s412_s22, %s413_s23  }
  0x13   :  { %s414_s26 = smov [#allocation5]   ;;  %s361_s30 = scalar_lea.hbm %s478_s1, 8192 }
  0x14   :  { %s28_s27 = sshll.u32 %s414_s26, 4  ;;  %p362_p8 = scmp.ne.s32.totalorder %s478_s1, %s361_s30  ;;  %s29_s27 = int_to_ptr.vmem [resolvable:$true] %s28_s27 }
  0x15   :  { %p365_p9 = scmp.lt.u32.totalorder %s361_s30, %s478_s1 }
  0x17   :  { %p367_p10 = pnand %p365_p9, %p362_p8 }
  0x19   :  { %370 = shalt.err (!%p367_p10)
}
  0x1a   :  { %s371_s8 = scalar_lea.vmem %s29_s27, 8192  ;;  %p376_p12 = scmp.lt.s32.totalorder %s29_s27, %s29_s27 }
  0x1b   :  { %p372_p11 = scmp.ne.s32.totalorder %s29_s27, %s371_s8  ;;  %p377_p13 = scmp.lt.s32.totalorder %s371_s8, %s371_s8 }
  0x1d   :  { %p378_p0 = por %p377_p13, %p376_p12 }
  0x1f   :  { %p379_p1 = pnand %p378_p0, %p372_p11 }
  0x21   :  { %382 = shalt.err (!%p379_p1)
}
  0x22   :  { %34 = dma.hbm_to_vmem [thread:$0]  %s478_s1, 8192, %s29_s27, [#allocation6], %s412_s22, %s412_s22, %s413_s23  }
  0x23   :  { %405 = dma.done.wait [#allocation3], 512  }
  0x24   :  { %406 = vsyncadd [#allocation3], 4294966784 }
  0x25   :  { %407 = dma.done.wait [#allocation6], 8192  }
  0x26   :  { %408 = vsyncadd [#allocation6], 4294959104  ;;  %v48_v0 = vld [vmem:[#allocation5 + $0x8] sm:$0xff]  ;;  %v50_v1 = vld [vmem:[#allocation5 + $0x18] sm:$0xff] }
  0x27   :  { %v47_v2 = vld [vmem:[#allocation5] sm:$0xff]  ;;  %v232_v3 = vpack.c.bf16 %v50_v1, %v48_v0  ;;  %v49_v4 = vld [vmem:[#allocation5 + $0x10] sm:$0xff]  ;;  %v52_v5 = vld [vmem:[#allocation5 + $0x28] sm:$0xff] }
  0x28   :  { %v54_v6 = vld [vmem:[#allocation5 + $0x38] sm:$0xff]  ;;  %v234_v7 = vpack.c.bf16 %v49_v4, %v47_v2  ;;  %v51_v9 = vld [vmem:[#allocation5 + $0x20] sm:$0xff]  ;;  %v53_v10 = vld [vmem:[#allocation5 + $0x30] sm:$0xff] }
  0x29   :  { %v236_v8 = vpack.c.bf16 %v54_v6, %v52_v5  ;;  %v56_v11 = vld [vmem:[#allocation5 + $0x48] sm:$0xff]  ;;  %233 = vmatprep.subr.bf16.mxu0 %v232_v3  ;;  %296 = vmatprep.subr.bf16.mxu1 %v232_v3  ;;  %v58_v12 = vld [vmem:[#allocation5 + $0x58] sm:$0xff]  ;;  %v238_v13 = vpack.c.bf16 %v53_v10, %v51_v9  ;;  %v55_v15 = vld [vmem:[#allocation5 + $0x40] sm:$0xff] }
  0x2a   :  { %235 = vmatpush1.bf16.msra.mxu0 %v234_v7  ;;  %312 = vmatpush1.bf16.msra.mxu1 %v234_v7  ;;  %v240_v14 = vpack.c.bf16 %v58_v12, %v56_v11  ;;  %v57_v16 = vld [vmem:[#allocation5 + $0x50] sm:$0xff]  ;;  %v60_v17 = vld [vmem:[#allocation5 + $0x68] sm:$0xff]  ;;  %v62_v18 = vld [vmem:[#allocation5 + $0x78] sm:$0xff] }
  0x2b   :  { %237 = vmatprep.subr.bf16.mxu0 %v236_v8  ;;  %297 = vmatprep.subr.bf16.mxu1 %v236_v8  ;;  %v242_v19 = vpack.c.bf16 %v57_v16, %v55_v15  ;;  %v244_v20 = vpack.c.bf16 %v62_v18, %v60_v17  ;;  %v59_v21 = vld [vmem:[#allocation5 + $0x60] sm:$0xff]  ;;  %v61_v22 = vld [vmem:[#allocation5 + $0x70] sm:$0xff]  ;;  %v64_v23 = vld [vmem:[#allocation5 + $0x88] sm:$0xff] }
  0x2c   :  { %v66_v24 = vld [vmem:[#allocation5 + $0x98] sm:$0xff]  ;;  %v246_v25 = vpack.c.bf16 %v61_v22, %v59_v21  ;;  %v63_v27 = vld [vmem:[#allocation5 + $0x80] sm:$0xff]  ;;  %v65_v28 = vld [vmem:[#allocation5 + $0x90] sm:$0xff] }
  0x2d   :  { %v248_v26 = vpack.c.bf16 %v66_v24, %v64_v23  ;;  %v68_v29 = vld [vmem:[#allocation5 + $0xa8] sm:$0xff]  ;;  %v70_v30 = vld [vmem:[#allocation5 + $0xb8] sm:$0xff]  ;;  %v250_v31 = vpack.c.bf16 %v65_v28, %v63_v27  ;;  %v67_v33 = vld [vmem:[#allocation5 + $0xa0] sm:$0xff] }
  0x2e   :  { %239 = vmatpush1.bf16.msra.mxu0 %v238_v13  ;;  %313 = vmatpush1.bf16.msra.mxu1 %v238_v13  ;;  %v252_v32 = vpack.c.bf16 %v70_v30, %v68_v29  ;;  %v69_v34 = vld [vmem:[#allocation5 + $0xb0] sm:$0xff]  ;;  %v72_v35 = vld [vmem:[#allocation5 + $0xc8] sm:$0xff]  ;;  %v74_v36 = vld [vmem:[#allocation5 + $0xd8] sm:$0xff] }
  0x2f   :  { %241 = vmatprep.subr.bf16.mxu0 %v240_v14  ;;  %298 = vmatprep.subr.bf16.mxu1 %v240_v14  ;;  %v254_v37 = vpack.c.bf16 %v69_v34, %v67_v33  ;;  %v71_v38 = vld [vmem:[#allocation5 + $0xc0] sm:$0xff]  ;;  %v256_v39 = vpack.c.bf16 %v74_v36, %v72_v35  ;;  %v73_v40 = vld [vmem:[#allocation5 + $0xd0] sm:$0xff]  ;;  %v44_v41 = vld [vmem:[#allocation2 + $0x8] sm:$0xff]  ;;  %v113_v36 = vlaneseq }
  0x30   :  { %v46_v42 = vld [vmem:[#allocation2 + $0x18] sm:$0xff]  ;;  %v76_v43 = vld [vmem:[#allocation5 + $0xe8] sm:$0xff]  ;;  %187 = vmatprep.mubr.f32.mxu0 %v44_v41  ;;  %v258_v45 = vpack.c.bf16 %v73_v40, %v71_v38  ;;  %v75_v47 = vld [vmem:[#allocation5 + $0xe0] sm:$0xff] }
  0x31   :  { %v78_v44 = vld [vmem:[#allocation5 + $0xf8] sm:$0xff]  ;;  %193 = vmatprep.mubr.f32.mxu1 %v46_v42  ;;  %v77_v48 = vld [vmem:[#allocation5 + $0xf0] sm:$0xff]  ;;  %v80_v49 = vld [vmem:[#allocation5 + $0x108] sm:$0xff] }
  0x32   :  { %243 = vmatpush1.bf16.msra.mxu0 %v242_v19  ;;  %314 = vmatpush1.bf16.msra.mxu1 %v242_v19  ;;  %v260_v46 = vpack.c.bf16 %v78_v44, %v76_v43  ;;  %v82_v50 = vld [vmem:[#allocation5 + $0x118] sm:$0xff]  ;;  %v262_v51 = vpack.c.bf16 %v77_v48, %v75_v47  ;;  %v79_v53 = vld [vmem:[#allocation5 + $0x100] sm:$0xff]  ;;  %v81_v54 = vld [vmem:[#allocation5 + $0x110] sm:$0xff] }
  0x33   :  { %245 = vmatprep.subr.bf16.mxu0 %v244_v20  ;;  %299 = vmatprep.subr.bf16.mxu1 %v244_v20  ;;  %v264_v52 = vpack.c.bf16 %v82_v50, %v80_v49  ;;  %v84_v55 = vld [vmem:[#allocation5 + $0x128] sm:$0xff]  ;;  %v86_v56 = vld [vmem:[#allocation5 + $0x138] sm:$0xff]  ;;  %v266_v57 = vpack.c.bf16 %v81_v54, %v79_v53  ;;  %v83_v59 = vld [vmem:[#allocation5 + $0x120] sm:$0xff] }
  0x34   :  { %v268_v58 = vpack.c.bf16 %v86_v56, %v84_v55  ;;  %v85_v60 = vld [vmem:[#allocation5 + $0x130] sm:$0xff]  ;;  %v88_v61 = vld [vmem:[#allocation5 + $0x148] sm:$0xff]  ;;  %v90_v62 = vld [vmem:[#allocation5 + $0x158] sm:$0xff] }
  0x35   :  { %v270_v63 = vpack.c.bf16 %v85_v60, %v83_v59  ;;  %v272_v0 = vpack.c.bf16 %v90_v62, %v88_v61  ;;  %v87_v1 = vld [vmem:[#allocation5 + $0x140] sm:$0xff]  ;;  %v89_v2 = vld [vmem:[#allocation5 + $0x150] sm:$0xff]  ;;  %v92_v3 = vld [vmem:[#allocation5 + $0x168] sm:$0xff] }
  0x36   :  { %247 = vmatpush1.bf16.msra.mxu0 %v246_v25  ;;  %315 = vmatpush1.bf16.msra.mxu1 %v246_v25  ;;  %v94_v4 = vld [vmem:[#allocation5 + $0x178] sm:$0xff]  ;;  %v274_v5 = vpack.c.bf16 %v89_v2, %v87_v1  ;;  %v91_v7 = vld [vmem:[#allocation5 + $0x160] sm:$0xff]  ;;  %v93_v8 = vld [vmem:[#allocation5 + $0x170] sm:$0xff] }
  0x37   :  { %249 = vmatprep.subr.bf16.mxu0 %v248_v26  ;;  %300 = vmatprep.subr.bf16.mxu1 %v248_v26  ;;  %v276_v6 = vpack.c.bf16 %v94_v4, %v92_v3  ;;  %v96_v9 = vld [vmem:[#allocation5 + $0x188] sm:$0xff]  ;;  %v98_v10 = vld [vmem:[#allocation5 + $0x198] sm:$0xff]  ;;  %v278_v11 = vpack.c.bf16 %v93_v8, %v91_v7  ;;  %v95_v13 = vld [vmem:[#allocation5 + $0x180] sm:$0xff] }
  0x38   :  { %v280_v12 = vpack.c.bf16 %v98_v10, %v96_v9  ;;  %v97_v14 = vld [vmem:[#allocation5 + $0x190] sm:$0xff]  ;;  %v100_v15 = vld [vmem:[#allocation5 + $0x1a8] sm:$0xff]  ;;  %v102_v16 = vld [vmem:[#allocation5 + $0x1b8] sm:$0xff] }
  0x39   :  { %v282_v17 = vpack.c.bf16 %v97_v14, %v95_v13  ;;  %v284_v18 = vpack.c.bf16 %v102_v16, %v100_v15  ;;  %v99_v19 = vld [vmem:[#allocation5 + $0x1a0] sm:$0xff]  ;;  %v101_v20 = vld [vmem:[#allocation5 + $0x1b0] sm:$0xff]  ;;  %v104_v21 = vld [vmem:[#allocation5 + $0x1c8] sm:$0xff] }
  0x3a   :  { %251 = vmatpush1.bf16.msra.mxu0 %v250_v31  ;;  %316 = vmatpush1.bf16.msra.mxu1 %v250_v31  ;;  %v106_v22 = vld [vmem:[#allocation5 + $0x1d8] sm:$0xff]  ;;  %v286_v23 = vpack.c.bf16 %v101_v20, %v99_v19  ;;  %v103_v25 = vld [vmem:[#allocation5 + $0x1c0] sm:$0xff]  ;;  %v105_v26 = vld [vmem:[#allocation5 + $0x1d0] sm:$0xff] }
  0x3b   :  { %253 = vmatprep.subr.bf16.mxu0 %v252_v32  ;;  %301 = vmatprep.subr.bf16.mxu1 %v252_v32  ;;  %v288_v24 = vpack.c.bf16 %v106_v22, %v104_v21  ;;  %v108_v27 = vld [vmem:[#allocation5 + $0x1e8] sm:$0xff]  ;;  %v110_v28 = vld [vmem:[#allocation5 + $0x1f8] sm:$0xff]  ;;  %v290_v29 = vpack.c.bf16 %v105_v26, %v103_v25  ;;  %v107_v31 = vld [vmem:[#allocation5 + $0x1e0] sm:$0xff] }
  0x3c   :  { %v292_v30 = vpack.c.bf16 %v110_v28, %v108_v27  ;;  %v109_v32 = vld [vmem:[#allocation5 + $0x1f0] sm:$0xff]  ;;  %v43_v34 = vld [vmem:[#allocation2] sm:$0xff] }
  0x3d   :  { %v294_v33 = vpack.c.bf16 %v109_v32, %v107_v31  ;;  %v45_v35 = vld [vmem:[#allocation2 + $0x10] sm:$0xff] }
  0x3e   :  { %255 = vmatpush1.bf16.msra.mxu0 %v254_v37  ;;  %317 = vmatpush1.bf16.msra.mxu1 %v254_v37  ;;  %v114_v37 = vshrl.u32 %v113_v36, 7 }
  0x3f   :  { %257 = vmatprep.subr.bf16.mxu0 %v256_v39  ;;  %302 = vmatprep.subr.bf16.mxu1 %v256_v39  ;;  %v111_v39 = vld [vmem:[%s479_s2] sm:$0x3]  ;;  %s415_s2 = smov [#allocation7]  }
  0x40   :  { %v119_v38 = vsub.s32 1, %v114_v37  ;;  %v115_v49 = vsub.s32 0, %v114_v37  ;;  %s219_s11 = sshll.u32 %s415_s2, 4  ;;  %s220_s11 = int_to_ptr.vmem [resolvable:$true] %s219_s11 }
  0x41   :  { %s383_s12 = scalar_lea.vmem %s220_s11, 256  ;;  %p388_p3 = scmp.lt.s32.totalorder %s220_s11, %s220_s11 }
  0x42   :  { %259 = vmatpush1.bf16.msra.mxu0 %v258_v45  ;;  %318 = vmatpush1.bf16.msra.mxu1 %v258_v45  ;;  %v120_v40 = vrot.slane %v111_v39, %v119_v38  ;;  %v116_v50 = vrot.slane %v111_v39, %v115_v49  ;;  %p384_p2 = scmp.ne.s32.totalorder %s220_s11, %s383_s12  ;;  %p389_p4 = scmp.lt.s32.totalorder %s383_s12, %s383_s12 }
  0x43   :  { %261 = vmatprep.subr.bf16.mxu0 %v260_v46  ;;  %303 = vmatprep.subr.bf16.mxu1 %v260_v46 }
  0x44   :  { %p390_p5 = por %p389_p4, %p388_p3 }
  0x46   :  { %263 = vmatpush1.bf16.msra.mxu0 %v262_v51  ;;  %319 = vmatpush1.bf16.msra.mxu1 %v262_v51  ;;  %p391_p6 = pnand %p390_p5, %p384_p2 }
  0x47   :  { %265 = vmatprep.subr.bf16.mxu0 %v264_v52  ;;  %304 = vmatprep.subr.bf16.mxu1 %v264_v52 }
  0x4a   :  { %267 = vmatpush1.bf16.msra.mxu0 %v266_v57  ;;  %320 = vmatpush1.bf16.msra.mxu1 %v266_v57 }
  0x4b   :  { %269 = vmatprep.subr.bf16.mxu0 %v268_v58  ;;  %305 = vmatprep.subr.bf16.mxu1 %v268_v58 }
  0x4e   :  { %271 = vmatpush1.bf16.msra.mxu0 %v270_v63  ;;  %321 = vmatpush1.bf16.msra.mxu1 %v270_v63 }
  0x4f   :  { %273 = vmatprep.subr.bf16.mxu0 %v272_v0  ;;  %306 = vmatprep.subr.bf16.mxu1 %v272_v0 }
  0x52   :  { %275 = vmatpush1.bf16.msra.mxu0 %v274_v5  ;;  %322 = vmatpush1.bf16.msra.mxu1 %v274_v5 }
  0x53   :  { %277 = vmatprep.subr.bf16.mxu0 %v276_v6  ;;  %307 = vmatprep.subr.bf16.mxu1 %v276_v6 }
  0x56   :  { %279 = vmatpush1.bf16.msra.mxu0 %v278_v11  ;;  %323 = vmatpush1.bf16.msra.mxu1 %v278_v11 }
  0x57   :  { %281 = vmatprep.subr.bf16.mxu0 %v280_v12  ;;  %308 = vmatprep.subr.bf16.mxu1 %v280_v12 }
  0x5a   :  { %283 = vmatpush1.bf16.msra.mxu0 %v282_v17  ;;  %324 = vmatpush1.bf16.msra.mxu1 %v282_v17 }
  0x5b   :  { %285 = vmatprep.subr.bf16.mxu0 %v284_v18  ;;  %309 = vmatprep.subr.bf16.mxu1 %v284_v18 }
  0x5e   :  { %287 = vmatpush1.bf16.msra.mxu0 %v286_v23  ;;  %325 = vmatpush1.bf16.msra.mxu1 %v286_v23 }
  0x5f   :  { %289 = vmatprep.subr.bf16.mxu0 %v288_v24  ;;  %310 = vmatprep.subr.bf16.mxu1 %v288_v24 }
  0x62   :  { %291 = vmatpush1.bf16.msra.mxu0 %v290_v29  ;;  %326 = vmatpush1.bf16.msra.mxu1 %v290_v29 }
  0x63   :  { %293 = vmatprep.subr.bf16.mxu0 %v292_v30  ;;  %311 = vmatprep.subr.bf16.mxu1 %v292_v30 }
  0x66   :  { %295 = vmatpush1.bf16.msra.mxu0 %v294_v33  ;;  %327 = vmatpush1.bf16.msra.mxu1 %v294_v33 }
  0x69   :  { %188 = vmatmul.mubr.f32.vlgmr.msra.gmra.mrb[0].mxu0 %v43_v34  ;;  %194 = vmatmul.mubr.f32.vlgmr.msra.gmra.mrb[0].mxu1 %v45_v35 }
 0x13c   :  { %v189_v41 = vpop.f32.mrb[0].mxu0  ;;  %v195_v42 = vpop.f32.mrb[0].mxu1 }
 0x13d   :  { %v191_v43 = vpop.f32.mrb[1].mxu0  ;;  %v197_v44 = vpop.f32.mrb[1].mxu1  ;;  %v190_v57 = vadd.f32 %v189_v41, %v116_v50  ;;  %v196_v59 = vadd.f32 %v195_v42, %v116_v50 }
 0x13e   :  { %v192_v45 = vadd.f32 %v191_v43, %v120_v40  ;;  %v198_v46 = vadd.f32 %v197_v44, %v120_v40 }
 0x140   :  { %v202_v47 = vmul.f32 0.70710677, %v192_v45  ;;  %v203_v48 = vmul.f32 0.70710677, %v198_v46  ;;  %v200_v53 = vmul.f32 0.5, %v192_v45  ;;  %v201_v55 = vmul.f32 0.5, %v198_v46 }
 0x142   :  { %335 = verf.f32 %v202_v47 }
 0x143   :  { %337 = verf.f32 %v203_v48 }
 0x14c   :  { %v336_v51 = vpop.eup %335 }
 0x14d   :  { %v338_v52 = vpop.eup %337  ;;  %v206_v54 = vadd.f32 1.0, %v336_v51 }
 0x14e   :  { %v207_v56 = vadd.f32 1.0, %v338_v52 }
 0x14f   :  { %v208_v58 = vmul.f32 %v206_v54, %v200_v53 }
 0x150   :  { %v209_v60 = vmul.f32 %v207_v56, %v201_v55 }
 0x151   :  { %v210_v61 = vmul.f32 %v208_v58, %v190_v57 }
 0x152   :  { %v211_v62 = vmul.f32 %v209_v60, %v196_v59 }
 0x153   :  { %212 = vst [vmem:[#allocation7] sm:$0xff] %v210_v61 }
 0x154   :  { %213 = vst [vmem:[#allocation7 + $0x8] sm:$0xff] %v211_v62 }
 0x155   :  { %394 = shalt.err (!%p391_p6)
}
 0x156   :  { %s395_s15 = scalar_lea.hbm %s480_s3, 256 }
 0x157   :  { %p396_p7 = scmp.ne.s32.totalorder %s480_s3, %s395_s15  ;;  %p399_p8 = scmp.lt.u32.totalorder %s395_s15, %s480_s3 }
 0x159   :  { %p401_p9 = pnand %p399_p8, %p396_p7 }
 0x15b   :  { %404 = shalt.err (!%p401_p9)
}
 0x15c   :  { %s416_s20 = smov 128   ;;  %s417_s21 = smov 8  }
 0x15d   :  { %225 = dma.vmem_to_hbm [thread:$0]  %s220_s11, 256, %s480_s3, [#allocation4], %s416_s20, %s416_s20, %s417_s21  }
 0x15e   :  { %409 = dma.done.wait [#allocation4], 256  }
 0x15f   :  { %410 = vsyncadd [#allocation4], 4294967040 }
 0x160   :  { %229 = vsyncpa [#allocation3], 1 }
 0x161   :  { %230 = vsyncpa [#allocation6], 1 }
 0x162   :  { %231 = vsyncpa [#allocation4], 1 }

</bundles_post_ra>
